<compile_context>
chip_gen: v6e
topology: v6e:2x2x1
jax: 0.10.0
libtpu: 0.0.40
codegen_flags: <defaults>
</compile_context>

<pallas_src>
import jax
import jax.numpy as jnp
from jax.experimental import pallas as pl
from jax.experimental.pallas import tpu as pltpu

LANE = 128  # vreg lane width


def _round_up(x, m):
    return ((x + m - 1) // m) * m


def _sublane(dtype):
    # Sublane packing multiple: 8 rows for 4-byte dtypes, 16 for 2-byte.
    return (8 * 4) // jnp.dtype(dtype).itemsize


def _make_fused_encoder_kernel(n_layers, out_pads):
    """One batch tile through the whole Linear(+ReLU) stack."""

    def kernel(x_ref, *refs):
        w_refs = refs[:n_layers]
        b_ref = refs[n_layers]
        o_ref = refs[n_layers + 1]

        h = x_ref[...]
        for i in range(n_layers):
            w = w_refs[i][...]
            # MXU matmul; inputs may be bf16, accumulation is always f32.
            h = jnp.dot(h.astype(w.dtype), w,
                        preferred_element_type=jnp.float32)
            # Bias row i from the VMEM-resident packed f32 bias slab (VPU add).
            h = h + b_ref[i:i + 1, :out_pads[i]]
            if i < n_layers - 1:          # ReLU after every layer but the last
                h = jnp.maximum(h, 0.0)
        o_ref[...] = h.astype(o_ref.dtype)

    return kernel


def pack_encoder_params(params, fin, param_dtype=jnp.float32):
    """Pack weights/biases for the fused kernel.

    params: list of (w, b) with w in [in, out] layout (transpose of PyTorch's
    [out, in]).  Intermediate output widths are zero-padded to 128 lanes
    (numerically exact: padded columns stay zero through bias/ReLU and hit
    zero rows of the next weight).  The LAST layer's output width is kept
    un-padded so the kernel writes the true narrow output.
    """
    n = len(params)
    out_dims = [int(w.shape[1]) for w, _ in params]
    out_pads = [_round_up(d, LANE) for d in out_dims[:-1]] + [out_dims[-1]]
    in_dims = [fin] + out_pads[:-1]

    w_padded = []
    for i, (w, _) in enumerate(params):
        wp = jnp.zeros((in_dims[i], out_pads[i]), param_dtype)
        wp = wp.at[: w.shape[0], : w.shape[1]].set(w.astype(param_dtype))
        w_padded.append(wp)

    bias_rows = _round_up(n, 8)
    bias_cols = _round_up(max(out_pads), LANE)
    # Bias slab stays f32 so bias-add/ReLU run in f32 on every generation.
    b_packed = jnp.zeros((bias_rows, bias_cols), jnp.float32)
    for i, (_, b) in enumerate(params):
        b_packed = b_packed.at[i, : b.shape[0]].set(b.astype(jnp.float32))

    meta = dict(n_layers=n, fin=fin, out_dims=tuple(out_dims),
                out_pads=tuple(out_pads), in_dims=tuple(in_dims),
                bias_shape=(bias_rows, bias_cols))
    return w_padded, b_packed, meta


def _choose_block_b(B, sub, max_block_b):
    """Batch tile: big (amortize per-step overhead), >=2 tiles when possible
    (so the 'parallel' grid axis can use both v7x TensorCores)."""
    if B <= sub:
        return B                           # full-dim block is always legal
    n_tiles = pl.cdiv(B, max_block_b)
    if B >= 2 * sub:
        n_tiles = max(n_tiles, 2)
    blk = _round_up(pl.cdiv(B, n_tiles), sub)
    return min(blk, _round_up(B, sub))


def encoder_forward(x, w_padded, b_packed, meta, *, max_block_b=8192):
    """Single fused pallas_call for the whole encoder stack."""
    B, fin = x.shape
    assert fin == meta["fin"]
    n = meta["n_layers"]
    out_dims = meta["out_dims"]
    out_pads = meta["out_pads"]
    in_dims = meta["in_dims"]
    d_out = out_dims[-1]

    x_bytes = jnp.dtype(x.dtype).itemsize
    sub = _sublane(x.dtype)
    blk = _choose_block_b(B, sub, max_block_b)
    # No jnp.pad: ragged final block rows are unspecified on read and clipped
    # on write; the kernel math is purely row-wise so valid rows are exact.
    grid = (pl.cdiv(B, blk),)

    # Advisory cost estimate reflecting the bytes actually transferred.
    param_bytes = (sum(int(w.size) * jnp.dtype(w.dtype).itemsize for w in w_padded)
                   + int(b_packed.size) * jnp.dtype(b_packed.dtype).itemsize)
    flops = 2 * B * sum(i_d * o_d
                        for i_d, o_d in zip((fin,) + out_dims[:-1], out_dims))
    bytes_accessed = int(B * fin * x_bytes + B * d_out * x_bytes + param_bytes)

    # Scoped-VMEM budget: double-buffered x/out tiles + resident params +
    # headroom for the f32 intermediate activations.  Covers v5e's smaller
    # 16 MiB default; stays at/under v7x's 64 MiB physical.
    vmem_need = (2 * blk * (fin + d_out) * x_bytes
                 + 2 * param_bytes
                 + 4 * blk * max(out_pads) * 4)
    vmem_limit = int(min(64 * 1024 * 1024,
                         max(32 * 1024 * 1024, 2 * vmem_need)))

    # x/out tiles march along the batch; weight/bias blocks have constant
    # index_maps so they stay resident in VMEM across grid iterations.
    in_specs = [pl.BlockSpec((blk, fin), lambda g: (g, 0))]
    for i in range(n):
        in_specs.append(
            pl.BlockSpec((in_dims[i], out_pads[i]), lambda g: (0, 0)))
    in_specs.append(pl.BlockSpec(meta["bias_shape"], lambda g: (0, 0)))

    out = pl.pallas_call(
        _make_fused_encoder_kernel(n, out_pads),
        out_shape=jax.ShapeDtypeStruct((B, d_out), x.dtype),
        grid=grid,
        in_specs=in_specs,
        out_specs=pl.BlockSpec((blk, d_out), lambda g: (g, 0)),
        compiler_params=pltpu.CompilerParams(
            dimension_semantics=("parallel",),
            vmem_limit_bytes=vmem_limit),
        cost_estimate=pl.CostEstimate(
            flops=int(flops), transcendentals=0, bytes_accessed=bytes_accessed),
    )(x, *w_padded, b_packed)
    return out


def init_linear_params(key, fan_in, fan_out):
    """Deterministic init mimicking nn.Linear default (uniform +/- 1/sqrt(fan_in))."""
    kw, kb = jax.random.split(key)
    bound = 1.0 / jnp.sqrt(jnp.float32(fan_in))
    # Stored directly in [in, out] layout (transpose of PyTorch's [out, in]).
    w = jax.random.uniform(kw, (fan_in, fan_out), jnp.float32, -bound, bound)
    b = jax.random.uniform(kb, (fan_out,), jnp.float32, -bound, bound)
    return w, b


def make_encoder_params(key, layer_dims):
    params = []
    keys = jax.random.split(key, len(layer_dims) - 1)
    for k, fi, fo in zip(keys, layer_dims[:-1], layer_dims[1:]):
        params.append(init_linear_params(k, fi, fo))
    return params


def encoder_forward_ref(x, params):
    """Pure-JAX reference: Sequential(Linear->ReLU, ..., Linear)."""
    n = len(params)
    h = x
    for i, (w, b) in enumerate(params):
        h = h @ w + b
        if i < n - 1:
            h = jnp.maximum(h, 0.0)
    return h


if __name__ == "__main__":
    key = jax.random.PRNGKey(0)
    k_x, k_p, k_x2 = jax.random.split(key, 3)

    # Small MLP-AE encoder: 64 -> 32 -> 16 -> 8
    layer_dims = (64, 32, 16, 8)
    params = make_encoder_params(k_p, layer_dims)

    # --- f32, single small tile (batch=8) ---
    x = jax.random.normal(k_x, (8, layer_dims[0]), jnp.float32)
    w_p, b_p, meta = pack_encoder_params(params, layer_dims[0], jnp.float32)
    out = jax.block_until_ready(encoder_forward(x, w_p, b_p, meta))
    ref = encoder_forward_ref(x, params)
    assert out.shape == ref.shape
    assert jnp.allclose(out, ref, atol=1e-4, rtol=1e-4), "f32 mismatch (B=8)"

    # --- f32, multi-tile grid with ragged final block (batch=300) ---
    x2 = jax.random.normal(k_x2, (300, layer_dims[0]), jnp.float32)
    out2 = jax.block_until_ready(encoder_forward(x2, w_p, b_p, meta))
    ref2 = encoder_forward_ref(x2, params)
    assert out2.shape == ref2.shape
    assert jnp.allclose(out2, ref2, atol=1e-4, rtol=1e-4), "f32 mismatch (B=300)"

    # --- bf16 storage for x/weights, f32 accumulation (halves HBM bytes) ---
    w_pb, b_pb, meta_b = pack_encoder_params(params, layer_dims[0], jnp.bfloat16)
    out3 = jax.block_until_ready(
        encoder_forward(x2.astype(jnp.bfloat16), w_pb, b_pb, meta_b))
    ref3 = encoder_forward_ref(x2, params)
    assert out3.shape == ref3.shape
    assert jnp.allclose(out3.astype(jnp.float32), ref3, atol=1e-1, rtol=1e-1), \
        "bf16 mismatch (B=300)"

    print("KERNEL_OK")
</pallas_src>

<mosaic_0001>
module attributes {stable_mosaic.version = 11 : i64} {
  func.func @kernel(%arg0: i32, %arg1: memref<8x64xf32, #tpu.memory_space<vmem>>, %arg2: memref<64x128xf32, #tpu.memory_space<vmem>>, %arg3: memref<128x128xf32, #tpu.memory_space<vmem>>, %arg4: memref<128x8xf32, #tpu.memory_space<vmem>>, %arg5: memref<8x128xf32, #tpu.memory_space<vmem>>, %arg6: memref<8x8xf32, #tpu.memory_space<vmem>>) attributes {dimension_semantics = [#tpu.dimension_semantics<parallel>], iteration_bounds = array<i64: 1>, scalar_prefetch = 0 : i64, scratch_operands = 0 : i64, tpu.core_type = #tpu.core_type<tc>, window_params = [{transform_indices = @transform_0, window_bounds = array<i64: 8, 64>}, {pipeline_mode = #tpu.pipeline_mode<synchronous>, transform_indices = @transform_1, window_bounds = array<i64: 64, 128>}, {pipeline_mode = #tpu.pipeline_mode<synchronous>, transform_indices = @transform_2, window_bounds = array<i64: 128, 128>}, {pipeline_mode = #tpu.pipeline_mode<synchronous>, transform_indices = @transform_3, window_bounds = array<i64: 128, 8>}, {pipeline_mode = #tpu.pipeline_mode<synchronous>, transform_indices = @transform_4, window_bounds = array<i64: 8, 128>}, {transform_indices = @transform_5, window_bounds = array<i64: 8, 8>}]} {
    %c0 = arith.constant 0 : index
    %c0_0 = arith.constant 0 : index
    %0 = vector.load %arg1[%c0, %c0_0] : memref<8x64xf32, #tpu.memory_space<vmem>>, vector<8x64xf32>
    %c0_1 = arith.constant 0 : index
    %c0_2 = arith.constant 0 : index
    %1 = vector.load %arg2[%c0_1, %c0_2] : memref<64x128xf32, #tpu.memory_space<vmem>>, vector<64x128xf32>
    %cst = arith.constant dense<0.000000e+00> : vector<8x128xf32>
    %2 = tpu.matmul %0, %1, %cst {dimension_numbers = #tpu.dot_dimension_numbers<[1], [0], [0], [1], [0, 0, 1, 1], [], []>} : vector<8x64xf32>, vector<64x128xf32>, vector<8x128xf32> -> vector<8x128xf32>
    %c0_3 = arith.constant 0 : index
    %c0_4 = arith.constant 0 : index
    %3 = vector.load %arg5[%c0_3, %c0_4] : memref<8x128xf32, #tpu.memory_space<vmem>>, vector<1x128xf32>
    %4 = vector.broadcast %3 : vector<1x128xf32> to vector<8x128xf32>
    %5 = arith.addf %2, %4 : vector<8x128xf32>
    %cst_5 = arith.constant 0.000000e+00 : f32
    %6 = vector.broadcast %cst_5 : f32 to vector<8x128xf32>
    %7 = arith.maximumf %5, %6 : vector<8x128xf32>
    %c0_6 = arith.constant 0 : index
    %c0_7 = arith.constant 0 : index
    %8 = vector.load %arg3[%c0_6, %c0_7] : memref<128x128xf32, #tpu.memory_space<vmem>>, vector<128x128xf32>
    %cst_8 = arith.constant dense<0.000000e+00> : vector<8x128xf32>
    %9 = tpu.matmul %7, %8, %cst_8 {dimension_numbers = #tpu.dot_dimension_numbers<[1], [0], [0], [1], [0, 0, 1, 1], [], []>} : vector<8x128xf32>, vector<128x128xf32>, vector<8x128xf32> -> vector<8x128xf32>
    %c1 = arith.constant 1 : index
    %c0_9 = arith.constant 0 : index
    %10 = vector.load %arg5[%c1, %c0_9] : memref<8x128xf32, #tpu.memory_space<vmem>>, vector<1x128xf32>
    %11 = vector.broadcast %10 : vector<1x128xf32> to vector<8x128xf32>
    %12 = arith.addf %9, %11 : vector<8x128xf32>
    %cst_10 = arith.constant 0.000000e+00 : f32
    %13 = vector.broadcast %cst_10 : f32 to vector<8x128xf32>
    %14 = arith.maximumf %12, %13 : vector<8x128xf32>
    %c0_11 = arith.constant 0 : index
    %c0_12 = arith.constant 0 : index
    %15 = vector.load %arg4[%c0_11, %c0_12] : memref<128x8xf32, #tpu.memory_space<vmem>>, vector<128x8xf32>
    %cst_13 = arith.constant dense<0.000000e+00> : vector<8x8xf32>
    %16 = tpu.matmul %14, %15, %cst_13 {dimension_numbers = #tpu.dot_dimension_numbers<[1], [0], [0], [1], [0, 0, 1, 1], [], []>} : vector<8x128xf32>, vector<128x8xf32>, vector<8x8xf32> -> vector<8x8xf32>
    %c2 = arith.constant 2 : index
    %c0_14 = arith.constant 0 : index
    %17 = vector.load %arg5[%c2, %c0_14] : memref<8x128xf32, #tpu.memory_space<vmem>>, vector<1x8xf32>
    %18 = vector.broadcast %17 : vector<1x8xf32> to vector<8x8xf32>
    %19 = arith.addf %16, %18 : vector<8x8xf32>
    %c0_15 = arith.constant 0 : index
    %c0_16 = arith.constant 0 : index
    %20 = vector.load %arg6[%c0_15, %c0_16] : memref<8x8xf32, #tpu.memory_space<vmem>>, vector<8x8xf32>
    tpu.vector_store %arg6[%c0_15, %c0_16], %19 {strides = array<i32>} : memref<8x8xf32, #tpu.memory_space<vmem>>, vector<8x8xf32>,
    return
  }
  func.func @transform_0(%arg0: i32) -> (i32, i32) {
    %c0_i32 = arith.constant 0 : i32
    %c0_i32_0 = arith.constant 0 : i32
    return %arg0, %c0_i32 : i32, i32
  }
  func.func @transform_1(%arg0: i32) -> (i32, i32) {
    %c0_i32 = arith.constant 0 : i32
    %c0_i32_0 = arith.constant 0 : i32
    %c0_i32_1 = arith.constant 0 : i32
    return %c0_i32, %c0_i32_0 : i32, i32
  }
  func.func @transform_2(%arg0: i32) -> (i32, i32) {
    %c0_i32 = arith.constant 0 : i32
    %c0_i32_0 = arith.constant 0 : i32
    %c0_i32_1 = arith.constant 0 : i32
    return %c0_i32, %c0_i32_0 : i32, i32
  }
  func.func @transform_3(%arg0: i32) -> (i32, i32) {
    %c0_i32 = arith.constant 0 : i32
    %c0_i32_0 = arith.constant 0 : i32
    %c0_i32_1 = arith.constant 0 : i32
    return %c0_i32, %c0_i32_0 : i32, i32
  }
  func.func @transform_4(%arg0: i32) -> (i32, i32) {
    %c0_i32 = arith.constant 0 : i32
    %c0_i32_0 = arith.constant 0 : i32
    %c0_i32_1 = arith.constant 0 : i32
    return %c0_i32, %c0_i32_0 : i32, i32
  }
  func.func @transform_5(%arg0: i32) -> (i32, i32) {
    %c0_i32 = arith.constant 0 : i32
    %c0_i32_0 = arith.constant 0 : i32
    return %arg0, %c0_i32 : i32, i32
  }
}

</mosaic_0001>

<bundles_post_ra>
// kernel: tpu_custom_call.1
= control target key start
LH: loop header
LB: loop body
LE: loop exit
PB: predicated region body
PF: predicated region fallthrough
CT: control target
= control target key end

     0   :  { %10 = vsyncpa [#allocation3], 0  ;;  %s737_s0 = inlined_call_operand.vmem [shape: f32[8,64], index: 0, kind: input, shape index: {}]   ;;  %s738_s1 = inlined_call_operand.hbm [shape: f32[64,128], index: 1, kind: input, shape index: {}]   ;;  %s739_s2 = inlined_call_operand.vmem [shape: f32[128,128], index: 2, kind: input, shape index: {}]   ;;  %s740_s3 = inlined_call_operand.vmem [shape: f32[128,8], index: 3, kind: input, shape index: {}]   ;;  %s741_s4 = inlined_call_operand.hbm [shape: f32[8,128], index: 4, kind: input, shape index: {}]   ;;  %s742_s5 = inlined_call_operand.hbm [shape: f32[8,8], index: 5, kind: output, shape index: {}]  }
   0x1   :  { %11 = vsyncpa [#allocation6], 0 }
   0x2   :  { %12 = vsyncpa [#allocation4], 0  ;;  %s546_s18 = smov [#allocation2]  }
   0x3   :  { %s20_s19 = sshll.u32 %s546_s18, 4  ;;  %s21_s19 = int_to_ptr.vmem [resolvable:$true] %s20_s19 }
   0x4   :  { %s488_s20 = scalar_lea.vmem %s21_s19, 1024  ;;  %p493_p1 = scmp.lt.s32.totalorder %s21_s19, %s21_s19 }
   0x5   :  { %p489_p0 = scmp.ne.s32.totalorder %s21_s19, %s488_s20  ;;  %p494_p2 = scmp.lt.s32.totalorder %s488_s20, %s488_s20 }
   0x7   :  { %p495_p3 = por %p494_p2, %p493_p1 }
   0x9   :  { %p496_p4 = pnand %p495_p3, %p489_p0 }
   0xb   :  { %499 = shalt.err (!%p496_p4)
}
   0xc   :  { %s547_s21 = smov 128   ;;  %s548_s22 = smov 8  }
   0xd   :  { %26 = dma.hbm_to_vmem [thread:$0]  %s738_s1, 1024, %s21_s19, [#allocation3], %s547_s21, %s547_s21, %s548_s22  }
   0xe   :  { %s549_s25 = smov [#allocation5]  }
   0xf   :  { %s37_s26 = sshll.u32 %s549_s25, 4  ;;  %s38_s26 = int_to_ptr.vmem [resolvable:$true] %s37_s26 }
  0x10   :  { %s508_s27 = scalar_lea.vmem %s38_s26, 128  ;;  %p513_p6 = scmp.lt.s32.totalorder %s38_s26, %s38_s26 }
  0x11   :  { %p509_p5 = scmp.ne.s32.totalorder %s38_s26, %s508_s27  ;;  %p514_p7 = scmp.lt.s32.totalorder %s508_s27, %s508_s27 }
  0x13   :  { %p515_p8 = por %p514_p7, %p513_p6 }
  0x15   :  { %p516_p9 = pnand %p515_p8, %p509_p5 }
  0x17   :  { %519 = shalt.err (!%p516_p9)
}
  0x18   :  { %40 = dma.hbm_to_vmem [thread:$0]  %s741_s4, 128, %s38_s26, [#allocation6]  }
  0x19   :  { %540 = dma.done.wait [#allocation3], 1024  }
  0x1a   :  { %541 = vsyncadd [#allocation3], 4294966272 }
  0x1b   :  { %542 = dma.done.wait [#allocation6], 128  }
  0x1c   :  { %543 = vsyncadd [#allocation6], 4294967168  ;;  %v550_v0 = vmov 0.0   ;;  %vm551_vm0 = vmmov 0   ;;  %v55_v1 = vld [vmem:[#allocation2 + $0x38] sm:$0xff]  ;;  %v54_v2 = vld [vmem:[#allocation2 + $0x30] sm:$0xff] }
  0x1d   :  { %384 = vmatprep.subr.mxu0 %v550_v0  ;;  %400 = vmatprep.mubr.msk.f32.mxu0 %vm551_vm0, %v550_v0  ;;  %v53_v3 = vld [vmem:[#allocation2 + $0x28] sm:$0xff]  ;;  %v151_v4 = vld [vmem:[%s739_s2 + $0x78] sm:$0xff]  ;;  %v150_v5 = vld [vmem:[%s739_s2 + $0x70] sm:$0xff]  ;;  %vm61_vm1 = vcmask 523264   ;;  %s552_s12 = smov [#allocation7]   ;;  %vm319_vm2 = vcmask 64512  }
  0x1e   :  { %403 = vmatprep.subr.mxu1 %v550_v0  ;;  %435 = vmatprep.mubr.msk.f32.mxu1 %vm551_vm0, %v550_v0  ;;  %v52_v6 = vld [vmem:[#allocation2 + $0x20] sm:$0xff]  ;;  %v149_v7 = vld [vmem:[%s739_s2 + $0x68] sm:$0xff]  ;;  %v51_v8 = vld [vmem:[#allocation2 + $0x18] sm:$0xff]  ;;  %s327_s13 = sshll.u32 %s552_s12, 4  ;;  %s328_s13 = int_to_ptr.vmem [resolvable:$true] %s327_s13 }
  0x1f   :  { %385 = vmatpush3.msra.mxu0 %v55_v1  ;;  %404 = vmatpush3.msra.mxu1 %v151_v4  ;;  %v148_v9 = vld [vmem:[%s739_s2 + $0x60] sm:$0xff]  ;;  %v50_v10 = vld [vmem:[#allocation2 + $0x10] sm:$0xff]  ;;  %v147_v11 = vld [vmem:[%s739_s2 + $0x58] sm:$0xff]  ;;  %s520_s14 = scalar_lea.vmem %s328_s13, 128  ;;  %p525_p11 = scmp.lt.s32.totalorder %s328_s13, %s328_s13 }
  0x20   :  { %386 = vmatprep.subr.mxu0 %v550_v0  ;;  %405 = vmatprep.subr.mxu1 %v550_v0  ;;  %v49_v12 = vld [vmem:[#allocation2 + $0x8] sm:$0xff]  ;;  %v146_v13 = vld [vmem:[%s739_s2 + $0x50] sm:$0xff]  ;;  %v48_v14 = vld [vmem:[#allocation2] sm:$0xff]  ;;  %p521_p10 = scmp.ne.s32.totalorder %s328_s13, %s520_s14  ;;  %p526_p12 = scmp.lt.s32.totalorder %s520_s14, %s520_s14 }
  0x21   :  { %387 = vmatpush3.msra.mxu0 %v54_v2  ;;  %406 = vmatpush3.msra.mxu1 %v150_v5  ;;  %v47_v15 = vld [vmem:[%s737_s0] sm:$0xff]  ;;  %v145_v16 = vld [vmem:[%s739_s2 + $0x48] sm:$0xff]  ;;  %v143_v18 = vld [vmem:[%s739_s2 + $0x38] sm:$0xff] }
  0x22   :  { %388 = vmatprep.subr.mxu0 %v550_v0  ;;  %407 = vmatprep.subr.mxu1 %v550_v0  ;;  %v144_v17 = vld [vmem:[%s739_s2 + $0x40] sm:$0xff]  ;;  %v142_v19 = vld [vmem:[%s739_s2 + $0x30] sm:$0xff]  ;;  %v141_v20 = vld [vmem:[%s739_s2 + $0x28] sm:$0xff]  ;;  %p527_p13 = por %p526_p12, %p525_p11 }
  0x23   :  { %389 = vmatpush3.msra.mxu0 %v53_v3  ;;  %408 = vmatpush3.msra.mxu1 %v149_v7  ;;  %v140_v21 = vld [vmem:[%s739_s2 + $0x20] sm:$0xff]  ;;  %v139_v22 = vld [vmem:[%s739_s2 + $0x18] sm:$0xff]  ;;  %v138_v23 = vld [vmem:[%s739_s2 + $0x10] sm:$0xff] }
  0x24   :  { %390 = vmatprep.subr.mxu0 %v550_v0  ;;  %409 = vmatprep.subr.mxu1 %v550_v0  ;;  %v137_v24 = vld [vmem:[%s739_s2 + $0x8] sm:$0xff]  ;;  %v136_v25 = vld [vmem:[%s739_s2] sm:$0xff]  ;;  %v243_v26 = vld [vmem:[%s740_s3 + $0x78] sm:$0xff]  ;;  %p528_p0 = pnand %p527_p13, %p521_p10 }
  0x25   :  { %391 = vmatpush3.msra.mxu0 %v52_v6  ;;  %410 = vmatpush3.msra.mxu1 %v148_v9  ;;  %v242_v27 = vld [vmem:[%s740_s3 + $0x70] sm:$0xff]  ;;  %v241_v28 = vld [vmem:[%s740_s3 + $0x68] sm:$0xff]  ;;  %v240_v29 = vld [vmem:[%s740_s3 + $0x60] sm:$0xff] }
  0x26   :  { %392 = vmatprep.subr.mxu0 %v550_v0  ;;  %411 = vmatprep.subr.mxu1 %v550_v0  ;;  %v239_v30 = vld [vmem:[%s740_s3 + $0x58] sm:$0xff]  ;;  %v238_v31 = vld [vmem:[%s740_s3 + $0x50] sm:$0xff]  ;;  %v237_v32 = vld [vmem:[%s740_s3 + $0x48] sm:$0xff] }
  0x27   :  { %393 = vmatpush3.msra.mxu0 %v51_v8  ;;  %412 = vmatpush3.msra.mxu1 %v147_v11  ;;  %v236_v33 = vld [vmem:[%s740_s3 + $0x40] sm:$0xff]  ;;  %v235_v34 = vld [vmem:[%s740_s3 + $0x38] sm:$0xff]  ;;  %v234_v35 = vld [vmem:[%s740_s3 + $0x30] sm:$0xff] }
  0x28   :  { %394 = vmatprep.subr.mxu0 %v550_v0  ;;  %413 = vmatprep.subr.mxu1 %v550_v0  ;;  %v233_v36 = vld [vmem:[%s740_s3 + $0x28] sm:$0xff]  ;;  %v232_v37 = vld [vmem:[%s740_s3 + $0x20] sm:$0xff]  ;;  %v231_v38 = vld [vmem:[%s740_s3 + $0x18] sm:$0xff] }
  0x29   :  { %395 = vmatpush3.msra.mxu0 %v50_v10  ;;  %414 = vmatpush3.msra.mxu1 %v146_v13  ;;  %v337_v39 = vld [vmem:[#allocation5] ss:$0 sm:$0xff]  ;;  %v230_v44 = vld [vmem:[%s740_s3 + $0x10] sm:$0xff]  ;;  %v229_v45 = vld [vmem:[%s740_s3 + $0x8] sm:$0xff] }
  0x2a   :  { %396 = vmatprep.subr.mxu0 %v550_v0  ;;  %415 = vmatprep.subr.mxu1 %v550_v0  ;;  %v228_v46 = vld [vmem:[%s740_s3] sm:$0xff] }
  0x2b   :  { %397 = vmatpush3.msra.mxu0 %v49_v12  ;;  %416 = vmatpush3.msra.mxu1 %v145_v16  ;;  %v339_v47 = vld [vmem:[#allocation5 + $0x1] ss:$0 sm:$0xff]  ;;  %v340_v52 = vld [vmem:[#allocation5 + $0x2] ss:$0 sm:$0xff] }
  0x2c   :  { %398 = vmatprep.subr.mxu0 %v550_v0  ;;  %417 = vmatprep.subr.mxu1 %v550_v0 }
  0x2d   :  { %399 = vmatpush3.msra.mxu0 %v48_v14  ;;  %418 = vmatpush3.msra.mxu1 %v144_v17 }
  0x2e   :  { %401 = vmatmul.mubr.msk.f32.vlgmr.msra.gmra.mxu0 %vm61_vm1, %v47_v15  ;;  %438 = vmatprep.subr.mxu0 %v550_v0 }
  0x2f   :  { %470 = vmatprep.mubr.msk.f32.mxu0 %vm551_vm0, %v550_v0  ;;  %419 = vmatprep.subr.mxu1 %v550_v0 }
  0x30   :  { %420 = vmatpush3.msra.mxu1 %v143_v18  ;;  %439 = vmatpush3.msra.mxu0 %v243_v26 }
  0x31   :  { %421 = vmatprep.subr.mxu1 %v550_v0  ;;  %440 = vmatprep.subr.mxu0 %v550_v0 }
  0x32   :  { %422 = vmatpush3.msra.mxu1 %v142_v19  ;;  %441 = vmatpush3.msra.mxu0 %v242_v27 }
  0x33   :  { %423 = vmatprep.subr.mxu1 %v550_v0  ;;  %442 = vmatprep.subr.mxu0 %v550_v0 }
  0x34   :  { %424 = vmatpush3.msra.mxu1 %v141_v20  ;;  %443 = vmatpush3.msra.mxu0 %v241_v28 }
  0x35   :  { %425 = vmatprep.subr.mxu1 %v550_v0  ;;  %444 = vmatprep.subr.mxu0 %v550_v0 }
  0x36   :  { %426 = vmatpush3.msra.mxu1 %v140_v21  ;;  %445 = vmatpush3.msra.mxu0 %v240_v29 }
  0x37   :  { %427 = vmatprep.subr.mxu1 %v550_v0  ;;  %446 = vmatprep.subr.mxu0 %v550_v0 }
  0x38   :  { %428 = vmatpush3.msra.mxu1 %v139_v22  ;;  %447 = vmatpush3.msra.mxu0 %v239_v30 }
  0x39   :  { %429 = vmatprep.subr.mxu1 %v550_v0  ;;  %448 = vmatprep.subr.mxu0 %v550_v0 }
  0x3a   :  { %430 = vmatpush3.msra.mxu1 %v138_v23  ;;  %449 = vmatpush3.msra.mxu0 %v238_v31 }
  0x3b   :  { %431 = vmatprep.subr.mxu1 %v550_v0  ;;  %450 = vmatprep.subr.mxu0 %v550_v0 }
  0x3c   :  { %432 = vmatpush3.msra.mxu1 %v137_v24  ;;  %451 = vmatpush3.msra.mxu0 %v237_v32 }
  0x3d   :  { %433 = vmatprep.subr.mxu1 %v550_v0  ;;  %452 = vmatprep.subr.mxu0 %v550_v0 }
  0x3e   :  { %434 = vmatpush3.msra.mxu1 %v136_v25  ;;  %453 = vmatpush3.msra.mxu0 %v236_v33 }
  0x3f   :  { %454 = vmatprep.subr.mxu0 %v550_v0 }
  0x40   :  { %455 = vmatpush3.msra.mxu0 %v235_v34 }
  0x41   :  { %456 = vmatprep.subr.mxu0 %v550_v0 }
  0x42   :  { %457 = vmatpush3.msra.mxu0 %v234_v35 }
  0x43   :  { %458 = vmatprep.subr.mxu0 %v550_v0 }
  0x44   :  { %459 = vmatpush3.msra.mxu0 %v233_v36 }
  0x45   :  { %460 = vmatprep.subr.mxu0 %v550_v0 }
  0x46   :  { %461 = vmatpush3.msra.mxu0 %v232_v37 }
  0x47   :  { %462 = vmatprep.subr.mxu0 %v550_v0 }
  0x48   :  { %463 = vmatpush3.msra.mxu0 %v231_v38 }
  0x49   :  { %464 = vmatprep.subr.mxu0 %v550_v0 }
  0x4a   :  { %465 = vmatpush3.msra.mxu0 %v230_v44 }
  0x4b   :  { %466 = vmatprep.subr.mxu0 %v550_v0 }
  0x4c   :  { %467 = vmatpush3.msra.mxu0 %v229_v45 }
  0x4d   :  { %468 = vmatprep.subr.mxu0 %v550_v0 }
  0x4e   :  { %469 = vmatpush3.msra.mxu0 %v228_v46 }
  0xee   :  { %v131_v40 = vpop.f32.mrf.mxu0 }
  0xef   :  { %v132_v41 = vadd.f32 %v337_v39, %v131_v40 }
  0xf0   :  { %v402_v42 = vpop.f32.mrf.mxu0 }
  0xf1   :  { %v135_v43 = vmax.f32 %v132_v41, 0.0 }
  0xf3   :  { %436 = vmatmul.mubr.f32.vlgmr.msra.gmra.mxu1 %v135_v43 }
 0x1b3   :  { %v223_v48 = vpop.f32.mrf.mxu1 }
 0x1b4   :  { %v224_v49 = vadd.f32 %v339_v47, %v223_v48 }
 0x1b5   :  { %v437_v50 = vpop.f32.mrf.mxu1 }
 0x1b6   :  { %v227_v51 = vmax.f32 %v224_v49, 0.0 }
 0x1b8   :  { %471 = vmatmul.mubr.f32.vlgmr.msra.gmra.mxu0 %v227_v51 }
 0x278   :  { %v315_v53 = vpop.f32.mrf.mxu0 }
 0x279   :  { %v316_v54 = vadd.f32 %v340_v52, %v315_v53 }
 0x27a   :  { %v472_v55 = vpop.f32.mrf.mxu0 }
 0x27b   :  { %320 = vst.msk [vmem:[#allocation7] sm:$0xff] %vm319_vm2, %v316_v54 }
 0x27c   :  { %531 = shalt.err (!%p528_p0)
}
 0x27d   :  { %330 = dma.vmem_to_hbm [thread:$0]  %s328_s13, 128, %s742_s5, [#allocation4]  }
 0x27e   :  { %544 = dma.done.wait [#allocation4], 128  }
 0x27f   :  { %545 = vsyncadd [#allocation4], 4294967168 }
 0x280   :  { %334 = vsyncpa [#allocation3], 1 }
 0x281   :  { %335 = vsyncpa [#allocation6], 1 }
 0x282   :  { %336 = vsyncpa [#allocation4], 1 }

</bundles_post_ra>
